<compile_context>
chip_gen: v7x
topology: tpu7x:2x2x1
jax: 0.10.0
libtpu: 0.0.40
codegen_flags: <defaults>
</compile_context>

<pallas_src>
import jax
import jax.numpy as jnp
from jax.experimental import pallas as pl
from jax.experimental.pallas import tpu as pltpu

EPS = 1e-5  # nn.LayerNorm default eps
_TRANS_B = (((1,), (1,)), ((), ()))  # q @ k^T expressed directly as dot_general


def _round_up(x, m):
    return (x + m - 1) // m * m


def _pick_batch_block(b):
    for c in (8, 4, 2, 1):
        if c <= b and b % c == 0:
            return c
    return 1


# ----------------------------- kernel helpers -------------------------------

def _layer_norm(x, gamma, beta):
    mu = jnp.mean(x, axis=-1, keepdims=True)
    xc = x - mu
    var = jnp.mean(xc * xc, axis=-1, keepdims=True)
    return xc * jax.lax.rsqrt(var + EPS) * gamma + beta


# ------------------------------ Pallas kernels -------------------------------

def make_embed_kernel(s_real, s_pad):
    def embed_kernel(patch_ref, wp_ref, cls_ref, pos_ref, g_ref, b_ref, o_ref):
        # patch_ref: (1, N, P) bf16   wp_ref: (P, D) bf16
        # cls/g/b: (1, D) f32         pos: (S, D) f32    o_ref: (1, Sp, D) f32
        emb = jnp.dot(patch_ref[0], wp_ref[...],
                      preferred_element_type=jnp.float32)            # (N, D) f32
        g = g_ref[...]
        b = b_ref[...]
        row0 = cls_ref[...] + pos_ref[0:1, :]                        # (1, D)
        rows = emb + pos_ref[1:s_real, :]                            # (N, D)
        o_ref[0, 0:1, :] = _layer_norm(row0, g, b)
        o_ref[0, 1:s_real, :] = _layer_norm(rows, g, b)
        if s_pad > s_real:                                           # zero pad rows
            o_ref[0, s_real:s_pad, :] = jnp.zeros(
                (s_pad - s_real, o_ref.shape[2]), jnp.float32)
    return embed_kernel


def make_transformer_kernel(n_head, s_real):
    def kernel(x_ref, ln1g_ref, ln1b_ref, wqkv_ref, bqkv_ref, wo_ref, bo_ref,
               ln2g_ref, ln2b_ref, wfc_ref, bfc_ref, wpj_ref, bpj_ref,
               o_ref, ctx_ref):
        layer = pl.program_id(1)

        # first layer for this batch block: load the embedded tokens into the
        # VMEM-resident residual stream (the output block, revisited over L).
        @pl.when(layer == 0)
        def _():
            o_ref[...] = x_ref[...]

        bt, sp, d = o_ref.shape
        hd = d // n_head
        x = o_ref[...].reshape(bt * sp, d)                           # residual, f32

        # key-padding additive bias (only needed when the sequence was padded)
        if sp != s_real:
            kidx = jax.lax.broadcasted_iota(jnp.int32, (1, sp), 1)
            kbias = jnp.where(kidx < s_real, 0.0, -1e30).astype(jnp.float32)
        else:
            kbias = None

        # ---- multi-head self-attention -------------------------------------
        h = _layer_norm(x, ln1g_ref[0], ln1b_ref[0])
        qkv = jnp.dot(h.astype(jnp.bfloat16), wqkv_ref[0],
                      preferred_element_type=jnp.float32) + bqkv_ref[0]
        q = qkv[:, 0 * d:1 * d]     # attention scale already folded into w/b
        k = qkv[:, 1 * d:2 * d]
        v = qkv[:, 2 * d:3 * d]

        # Per-image / per-head scores; head outputs land in a VMEM scratch
        # (no concatenate).
        # TODO(synk): replace the unrolled head loop with a single
        # head-batched dot_general once multi-batch-dim dot lowering is
        # guaranteed on Mosaic.
        for i in range(bt):
            r = i * sp
            for hh in range(n_head):
                c = hh * hd
                qh = q[r:r + sp, c:c + hd].astype(jnp.bfloat16)
                kh = k[r:r + sp, c:c + hd].astype(jnp.bfloat16)
                vh = v[r:r + sp, c:c + hd].astype(jnp.bfloat16)
                s = jax.lax.dot_general(qh, kh, _TRANS_B,
                                        preferred_element_type=jnp.float32)
                if kbias is not None:
                    s = s + kbias
                s = s - jnp.max(s, axis=-1, keepdims=True)
                e = jnp.exp(s)
                denom = jnp.sum(e, axis=-1, keepdims=True)
                p = e * pl.reciprocal(denom, approx=True)
                pv = jnp.dot(p.astype(jnp.bfloat16), vh,
                             preferred_element_type=jnp.float32)
                ctx_ref[r:r + sp, c:c + hd] = pv.astype(jnp.bfloat16)

        attn = jnp.dot(ctx_ref[...], wo_ref[0],
                       preferred_element_type=jnp.float32) + bo_ref[0]
        x = x + attn

        # ---- MLP with QuickGELU ---------------------------------------------
        h2 = _layer_norm(x, ln2g_ref[0], ln2b_ref[0])
        hid = jnp.dot(h2.astype(jnp.bfloat16), wfc_ref[0],
                      preferred_element_type=jnp.float32) + bfc_ref[0]
        hid = hid * jax.nn.sigmoid(1.702 * hid)                      # QuickGELU
        mlp = jnp.dot(hid.astype(jnp.bfloat16), wpj_ref[0],
                      preferred_element_type=jnp.float32) + bpj_ref[0]
        x = x + mlp

        o_ref[...] = x.reshape(bt, sp, d)
    return kernel


def head_kernel(xcls_ref, g_ref, b_ref, proj_ref, o_ref):
    x = _layer_norm(xcls_ref[...], g_ref[...], b_ref[...])
    o_ref[...] = jnp.dot(x.astype(jnp.bfloat16), proj_ref[...],
                         preferred_element_type=jnp.float32)


# ------------------------------ wrappers --------------------------------------

def extract_patches(x, ps):
    # (B, 3, H, W) NCHW -> (B, num_patches, 3*ps*ps); inner order (C, ph, pw)
    # matches the Conv2d weight flattening.
    B, C, H, W = x.shape
    gh, gw = H // ps, W // ps
    x = x.reshape(B, C, gh, ps, gw, ps)
    x = x.transpose(0, 2, 4, 1, 3, 5)
    return x.reshape(B, gh * gw, C * ps * ps)


def run_embed(patches, wp, cls_row, pos, g, b, s_pad):
    B, N, P = patches.shape
    D = wp.shape[1]
    S = N + 1
    return pl.pallas_call(
        make_embed_kernel(S, s_pad),
        out_shape=jax.ShapeDtypeStruct((B, s_pad, D), jnp.float32),
        grid=(B,),
        in_specs=[
            pl.BlockSpec((1, N, P), lambda i: (i, 0, 0)),
            pl.BlockSpec((P, D), lambda i: (0, 0)),
            pl.BlockSpec((1, D), lambda i: (0, 0)),
            pl.BlockSpec((S, D), lambda i: (0, 0)),
            pl.BlockSpec((1, D), lambda i: (0, 0)),
            pl.BlockSpec((1, D), lambda i: (0, 0)),
        ],
        out_specs=pl.BlockSpec((1, s_pad, D), lambda i: (i, 0, 0)),
        compiler_params=pltpu.CompilerParams(dimension_semantics=("parallel",)),
    )(patches, wp, cls_row, pos, g, b)


def _transformer_vmem_limit(bt, sp, d):
    act = bt * sp * d * 4                                     # one f32 act block
    wts = (3 * d * d + d * d + 4 * d * d + 4 * d * d) * 2     # bf16 weights/layer
    small = (2 * d + 3 * d + d + 2 * d + 4 * d + d) * 4       # LN + biases/layer
    est = 4 * act + 2 * (wts + small) + bt * sp * d * 2 + (8 << 20)
    return int(min(max(est, 32 << 20), 64 << 20))


def run_transformer(x, prep, n_head, s_real, bt):
    B, Sp, D = x.shape
    L = prep["w_qkv"].shape[0]

    def wspec(r, c):
        return pl.BlockSpec((1, r, c), lambda b, l: (l, 0, 0))

    xspec = pl.BlockSpec((bt, Sp, D), lambda b, l: (b, 0, 0))

    return pl.pallas_call(
        make_transformer_kernel(n_head, s_real),
        out_shape=jax.ShapeDtypeStruct((B, Sp, D), jnp.float32),
        grid=(B // bt, L),
        in_specs=[
            xspec,
            wspec(1, D), wspec(1, D),                 # ln1
            wspec(D, 3 * D), wspec(1, 3 * D),         # qkv (scale folded, bf16)
            wspec(D, D), wspec(1, D),                 # attention out-proj
            wspec(1, D), wspec(1, D),                 # ln2
            wspec(D, 4 * D), wspec(1, 4 * D),         # mlp c_fc
            wspec(4 * D, D), wspec(1, D),             # mlp c_proj
        ],
        out_specs=xspec,
        scratch_shapes=[pltpu.VMEM((bt * Sp, D), jnp.bfloat16)],
        compiler_params=pltpu.CompilerParams(
            dimension_semantics=("parallel", "arbitrary"),
            vmem_limit_bytes=_transformer_vmem_limit(bt, Sp, D)),
    )(x,
      prep["ln1_g"], prep["ln1_b"], prep["w_qkv"], prep["b_qkv"],
      prep["w_out"], prep["b_out"], prep["ln2_g"], prep["ln2_b"],
      prep["w_fc"], prep["b_fc"], prep["w_proj"], prep["b_proj"])


def run_head(x_cls, g, b, proj):
    B, D = x_cls.shape
    out_dim = proj.shape[1]
    vspec = pl.BlockSpec(memory_space=pltpu.MemorySpace.VMEM)
    return pl.pallas_call(
        head_kernel,
        out_shape=jax.ShapeDtypeStruct((B, out_dim), jnp.float32),
        in_specs=[vspec, vspec, vspec, vspec],
        out_specs=vspec,
    )(x_cls, g, b, proj)


# --------------------------- parameter preparation ----------------------------

def prepare_params(params, cfg):
    D, H = cfg["width"], cfg["heads"]
    L = len(params["layers"])
    hd = D // H
    scale = hd ** (-0.5)
    f32, bf16 = jnp.float32, jnp.bfloat16

    def stack(name):
        return jnp.stack([lp[name] for lp in params["layers"]])

    # fold the 1/sqrt(hd) attention scale into the Q columns of w_qkv / b_qkv
    qkv_scale = jnp.concatenate(
        [jnp.full((D,), scale, f32), jnp.ones((2 * D,), f32)])

    return dict(
        wp=params["conv_w"].reshape(D, -1).T.astype(bf16),            # (P, D)
        cls=params["cls"].reshape(1, D).astype(f32),
        pos=params["pos"].astype(f32),
        ln_pre_g=params["ln_pre_g"].reshape(1, D).astype(f32),
        ln_pre_b=params["ln_pre_b"].reshape(1, D).astype(f32),
        ln_post_g=params["ln_post_g"].reshape(1, D).astype(f32),
        ln_post_b=params["ln_post_b"].reshape(1, D).astype(f32),
        proj=params["proj"].astype(bf16),
        ln1_g=stack("ln1_g").reshape(L, 1, D).astype(f32),
        ln1_b=stack("ln1_b").reshape(L, 1, D).astype(f32),
        w_qkv=(stack("w_qkv") * qkv_scale[None, None, :]).astype(bf16),
        b_qkv=(stack("b_qkv") * qkv_scale[None, :]).reshape(L, 1, 3 * D).astype(f32),
        w_out=stack("w_out").astype(bf16),
        b_out=stack("b_out").reshape(L, 1, D).astype(f32),
        ln2_g=stack("ln2_g").reshape(L, 1, D).astype(f32),
        ln2_b=stack("ln2_b").reshape(L, 1, D).astype(f32),
        w_fc=stack("w_fc").astype(bf16),
        b_fc=stack("b_fc").reshape(L, 1, 4 * D).astype(f32),
        w_proj=stack("w_proj").astype(bf16),
        b_proj=stack("b_proj").reshape(L, 1, D).astype(f32),
    )


def vit_forward(x_img, params, cfg):
    ps, heads = cfg["patch_size"], cfg["heads"]
    prep = prepare_params(params, cfg)
    patches = extract_patches(x_img, ps).astype(jnp.bfloat16)         # (B, N, P)
    B, N, _ = patches.shape
    S = N + 1
    Sp = _round_up(S, 8)                                              # sublane pad
    x = run_embed(patches, prep["wp"], prep["cls"], prep["pos"],
                  prep["ln_pre_g"], prep["ln_pre_b"], Sp)
    bt = _pick_batch_block(B)
    x = run_transformer(x, prep, heads, S, bt)
    return run_head(x[:, 0, :], prep["ln_post_g"], prep["ln_post_b"], prep["proj"])


# ------------------------------ reference (pure JAX) --------------------------

def _ln_ref(x, g, b):
    mu = jnp.mean(x, axis=-1, keepdims=True)
    var = jnp.mean((x - mu) ** 2, axis=-1, keepdims=True)
    return (x - mu) * jax.lax.rsqrt(var + EPS) * g + b


def _mm(a, b):
    # mirror the kernel numerics: bf16 MXU inputs, f32 accumulation
    return jnp.dot(a.astype(jnp.bfloat16), b.astype(jnp.bfloat16),
                   preferred_element_type=jnp.float32)


def reference_forward(x_img, params, cfg):
    ps, width, heads = cfg["patch_size"], cfg["width"], cfg["heads"]
    bf16 = jnp.bfloat16
    patches = extract_patches(x_img, ps)
    wp = params["conv_w"].reshape(width, -1).T
    emb = _mm(patches, wp)
    B = x_img.shape[0]
    cls = jnp.broadcast_to(params["cls"][None, None, :], (B, 1, width))
    x = jnp.concatenate([cls, emb], axis=1) + params["pos"][None]
    x = _ln_ref(x, params["ln_pre_g"], params["ln_pre_b"])
    for lp in params["layers"]:
        h = _ln_ref(x, lp["ln1_g"], lp["ln1_b"])
        qkv = _mm(h, lp["w_qkv"]) + lp["b_qkv"]
        q, k, v = jnp.split(qkv, 3, axis=-1)
        Bq, S, D = q.shape
        hd = D // heads
        q = (q * hd ** (-0.5)).reshape(Bq, S, heads, hd)
        k = k.reshape(Bq, S, heads, hd)
        v = v.reshape(Bq, S, heads, hd)
        s = jnp.einsum("bshd,bthd->bhst", q.astype(bf16), k.astype(bf16),
                       preferred_element_type=jnp.float32)
        p = jax.nn.softmax(s, axis=-1)
        ctx = jnp.einsum("bhst,bthd->bshd", p.astype(bf16), v.astype(bf16),
                         preferred_element_type=jnp.float32).reshape(Bq, S, D)
        x = x + _mm(ctx, lp["w_out"]) + lp["b_out"]
        h2 = _ln_ref(x, lp["ln2_g"], lp["ln2_b"])
        hid = _mm(h2, lp["w_fc"]) + lp["b_fc"]
        hid = hid * jax.nn.sigmoid(1.702 * hid)
        x = x + _mm(hid, lp["w_proj"]) + lp["b_proj"]
    xc = _ln_ref(x[:, 0, :], params["ln_post_g"], params["ln_post_b"])
    return _mm(xc, params["proj"])


# ------------------------------ params ----------------------------------------

def init_params(key, cfg):
    width, ps, layers, out_dim = cfg["width"], cfg["patch_size"], cfg["layers"], cfg["output_dim"]
    n_patches = (cfg["image_size"] // ps) ** 2
    scale = width ** (-0.5)
    keys = iter(jax.random.split(key, 16 + 12 * layers))

    def nrm(shape, s=0.02):
        return s * jax.random.normal(next(keys), shape, jnp.float32)

    params = dict(
        conv_w=nrm((width, 3, ps, ps)),
        cls=scale * jax.random.normal(next(keys), (width,), jnp.float32),
        pos=scale * jax.random.normal(next(keys), (n_patches + 1, width), jnp.float32),
        ln_pre_g=1.0 + nrm((width,), 0.05), ln_pre_b=nrm((width,), 0.05),
        ln_post_g=1.0 + nrm((width,), 0.05), ln_post_b=nrm((width,), 0.05),
        proj=scale * jax.random.normal(next(keys), (width, out_dim), jnp.float32),
        layers=[],
    )
    for _ in range(layers):
        params["layers"].append(dict(
            ln1_g=1.0 + nrm((width,), 0.05), ln1_b=nrm((width,), 0.05),
            w_qkv=nrm((width, 3 * width)), b_qkv=nrm((3 * width,)),
            w_out=nrm((width, width)), b_out=nrm((width,)),
            ln2_g=1.0 + nrm((width,), 0.05), ln2_b=nrm((width,), 0.05),
            w_fc=nrm((width, 4 * width)), b_fc=nrm((4 * width,)),
            w_proj=nrm((4 * width, width)), b_proj=nrm((width,)),
        ))
    return params


# ------------------------------ main -------------------------------------------

if __name__ == "__main__":
    cfg = dict(image_size=16, patch_size=8, width=32, layers=2, heads=4,
               mlp_ratio=4.0, output_dim=16)

    key = jax.random.PRNGKey(0)
    pkey, xkey = jax.random.split(key)
    params = init_params(pkey, cfg)
    x = jax.random.normal(xkey, (2, 3, cfg["image_size"], cfg["image_size"]),
                          jnp.float32)

    out = vit_forward(x, params, cfg)
    out = jax.block_until_ready(out)

    ref = reference_forward(x, params, cfg)
    assert out.shape == (2, cfg["output_dim"]), out.shape
    # bf16 MXU inputs + approx-reciprocal softmax => slightly looser tolerance
    assert bool(jnp.allclose(out, ref, atol=5e-2, rtol=5e-2)), \
        "mismatch vs pure-JAX reference"

    print("KERNEL_OK")
</pallas_src>

<mosaic_0001>
module attributes {stable_mosaic.version = 11 : i64} {
  func.func @embed_kernel(%arg0: i32, %arg1: memref<1x4x192xbf16, #tpu.memory_space<vmem>>, %arg2: memref<192x32xbf16, #tpu.memory_space<vmem>>, %arg3: memref<1x32xf32, #tpu.memory_space<vmem>>, %arg4: memref<5x32xf32, #tpu.memory_space<vmem>>, %arg5: memref<1x32xf32, #tpu.memory_space<vmem>>, %arg6: memref<1x32xf32, #tpu.memory_space<vmem>>, %arg7: memref<1x8x32xf32, #tpu.memory_space<vmem>>) attributes {dimension_semantics = [#tpu.dimension_semantics<parallel>], iteration_bounds = array<i64: 2>, scalar_prefetch = 0 : i64, scratch_operands = 0 : i64, tpu.core_type = #tpu.core_type<tc>, window_params = [{transform_indices = @transform_0, window_bounds = array<i64: 1, 4, 192>}, {pipeline_mode = #tpu.pipeline_mode<synchronous>, transform_indices = @transform_1, window_bounds = array<i64: 192, 32>}, {pipeline_mode = #tpu.pipeline_mode<synchronous>, transform_indices = @transform_2, window_bounds = array<i64: 1, 32>}, {pipeline_mode = #tpu.pipeline_mode<synchronous>, transform_indices = @transform_3, window_bounds = array<i64: 5, 32>}, {pipeline_mode = #tpu.pipeline_mode<synchronous>, transform_indices = @transform_4, window_bounds = array<i64: 1, 32>}, {pipeline_mode = #tpu.pipeline_mode<synchronous>, transform_indices = @transform_5, window_bounds = array<i64: 1, 32>}, {transform_indices = @transform_6, window_bounds = array<i64: 1, 8, 32>}]} {
    %c0 = arith.constant 0 : index
    %c0_0 = arith.constant 0 : index
    %c0_1 = arith.constant 0 : index
    %0 = vector.load %arg1[%c0, %c0_0, %c0_1] : memref<1x4x192xbf16, #tpu.memory_space<vmem>>, vector<1x4x192xbf16>
    %1 = vector.shape_cast %0 : vector<1x4x192xbf16> to vector<4x192xbf16>
    %c0_2 = arith.constant 0 : index
    %c0_3 = arith.constant 0 : index
    %2 = vector.load %arg2[%c0_2, %c0_3] : memref<192x32xbf16, #tpu.memory_space<vmem>>, vector<192x32xbf16>
    %cst = arith.constant dense<0.000000e+00> : vector<4x32xf32>
    %3 = tpu.matmul %1, %2, %cst {dimension_numbers = #tpu.dot_dimension_numbers<[1], [0], [0], [1], [0, 0, 1, 1], [], []>} : vector<4x192xbf16>, vector<192x32xbf16>, vector<4x32xf32> -> vector<4x32xf32>
    %c0_4 = arith.constant 0 : index
    %c0_5 = arith.constant 0 : index
    %4 = vector.load %arg5[%c0_4, %c0_5] : memref<1x32xf32, #tpu.memory_space<vmem>>, vector<1x32xf32>
    %c0_6 = arith.constant 0 : index
    %c0_7 = arith.constant 0 : index
    %5 = vector.load %arg6[%c0_6, %c0_7] : memref<1x32xf32, #tpu.memory_space<vmem>>, vector<1x32xf32>
    %c0_8 = arith.constant 0 : index
    %c0_9 = arith.constant 0 : index
    %6 = vector.load %arg3[%c0_8, %c0_9] : memref<1x32xf32, #tpu.memory_space<vmem>>, vector<1x32xf32>
    %c0_10 = arith.constant 0 : index
    %c0_11 = arith.constant 0 : index
    %7 = vector.load %arg4[%c0_10, %c0_11] : memref<5x32xf32, #tpu.memory_space<vmem>>, vector<1x32xf32>
    %8 = arith.addf %6, %7 : vector<1x32xf32>
    %c1 = arith.constant 1 : index
    %c0_12 = arith.constant 0 : index
    %9 = vector.load %arg4[%c1, %c0_12] : memref<5x32xf32, #tpu.memory_space<vmem>>, vector<4x32xf32>
    %10 = arith.addf %3, %9 : vector<4x32xf32>
    %cst_13 = arith.constant dense<0.000000e+00> : vector<1xf32>
    %11 = vector.multi_reduction <add>, %8, %cst_13 [1] : vector<1x32xf32> to vector<1xf32>
    %12 = vector.shape_cast %11 : vector<1xf32> to vector<1x1xf32>
    %cst_14 = arith.constant 3.200000e+01 : f32
    %13 = vector.broadcast %cst_14 : f32 to vector<1x1xf32>
    %14 = arith.divf %12, %13 : vector<1x1xf32>
    %15 = vector.broadcast %14 : vector<1x1xf32> to vector<1x32xf32>
    %16 = arith.subf %8, %15 : vector<1x32xf32>
    %17 = arith.mulf %16, %16 : vector<1x32xf32>
    %cst_15 = arith.constant dense<0.000000e+00> : vector<1xf32>
    %18 = vector.multi_reduction <add>, %17, %cst_15 [1] : vector<1x32xf32> to vector<1xf32>
    %19 = vector.shape_cast %18 : vector<1xf32> to vector<1x1xf32>
    %cst_16 = arith.constant 3.200000e+01 : f32
    %20 = vector.broadcast %cst_16 : f32 to vector<1x1xf32>
    %21 = arith.divf %19, %20 : vector<1x1xf32>
    %cst_17 = arith.constant 9.99999974E-6 : f32
    %22 = vector.broadcast %cst_17 : f32 to vector<1x1xf32>
    %23 = arith.addf %21, %22 : vector<1x1xf32>
    %24 = math.rsqrt %23 : vector<1x1xf32>
    %25 = vector.broadcast %24 : vector<1x1xf32> to vector<1x32xf32>
    %26 = arith.mulf %16, %25 : vector<1x32xf32>
    %27 = arith.mulf %26, %4 : vector<1x32xf32>
    %28 = arith.addf %27, %5 : vector<1x32xf32>
    %c0_18 = arith.constant 0 : index
    %c0_19 = arith.constant 0 : index
    %c0_20 = arith.constant 0 : index
    %29 = vector.load %arg7[%c0_18, %c0_19, %c0_20] : memref<1x8x32xf32, #tpu.memory_space<vmem>>, vector<1x1x32xf32>
    %30 = vector.shape_cast %29 : vector<1x1x32xf32> to vector<1x32xf32>
    %31 = vector.shape_cast %28 : vector<1x32xf32> to vector<1x1x32xf32>
    tpu.vector_store %arg7[%c0_18, %c0_19, %c0_20], %31 {strides = array<i32>} : memref<1x8x32xf32, #tpu.memory_space<vmem>>, vector<1x1x32xf32>,
    %cst_21 = arith.constant dense<0.000000e+00> : vector<4xf32>
    %32 = vector.multi_reduction <add>, %10, %cst_21 [1] : vector<4x32xf32> to vector<4xf32>
    %33 = vector.shape_cast %32 : vector<4xf32> to vector<4x1xf32>
    %cst_22 = arith.constant 3.200000e+01 : f32
    %34 = vector.broadcast %cst_22 : f32 to vector<4x1xf32>
    %35 = arith.divf %33, %34 : vector<4x1xf32>
    %36 = vector.broadcast %35 : vector<4x1xf32> to vector<4x32xf32>
    %37 = arith.subf %10, %36 : vector<4x32xf32>
    %38 = arith.mulf %37, %37 : vector<4x32xf32>
    %cst_23 = arith.constant dense<0.000000e+00> : vector<4xf32>
    %39 = vector.multi_reduction <add>, %38, %cst_23 [1] : vector<4x32xf32> to vector<4xf32>
    %40 = vector.shape_cast %39 : vector<4xf32> to vector<4x1xf32>
    %cst_24 = arith.constant 3.200000e+01 : f32
    %41 = vector.broadcast %cst_24 : f32 to vector<4x1xf32>
    %42 = arith.divf %40, %41 : vector<4x1xf32>
    %cst_25 = arith.constant 9.99999974E-6 : f32
    %43 = vector.broadcast %cst_25 : f32 to vector<4x1xf32>
    %44 = arith.addf %42, %43 : vector<4x1xf32>
    %45 = math.rsqrt %44 : vector<4x1xf32>
    %46 = vector.broadcast %45 : vector<4x1xf32> to vector<4x32xf32>
    %47 = arith.mulf %37, %46 : vector<4x32xf32>
    %48 = vector.broadcast %4 : vector<1x32xf32> to vector<4x32xf32>
    %49 = arith.mulf %47, %48 : vector<4x32xf32>
    %50 = vector.broadcast %5 : vector<1x32xf32> to vector<4x32xf32>
    %51 = arith.addf %49, %50 : vector<4x32xf32>
    %c0_26 = arith.constant 0 : index
    %c1_27 = arith.constant 1 : index
    %c0_28 = arith.constant 0 : index
    %52 = vector.load %arg7[%c0_26, %c1_27, %c0_28] : memref<1x8x32xf32, #tpu.memory_space<vmem>>, vector<1x4x32xf32>
    %53 = vector.shape_cast %52 : vector<1x4x32xf32> to vector<4x32xf32>
    %54 = vector.shape_cast %51 : vector<4x32xf32> to vector<1x4x32xf32>
    tpu.vector_store %arg7[%c0_26, %c1_27, %c0_28], %54 {strides = array<i32>} : memref<1x8x32xf32, #tpu.memory_space<vmem>>, vector<1x4x32xf32>,
    %cst_29 = arith.constant 0.000000e+00 : f32
    %55 = vector.broadcast %cst_29 : f32 to vector<3x32xf32>
    %c0_30 = arith.constant 0 : index
    %c5 = arith.constant 5 : index
    %c0_31 = arith.constant 0 : index
    %56 = vector.load %arg7[%c0_30, %c5, %c0_31] : memref<1x8x32xf32, #tpu.memory_space<vmem>>, vector<1x3x32xf32>
    %57 = vector.shape_cast %56 : vector<1x3x32xf32> to vector<3x32xf32>
    %58 = vector.shape_cast %55 : vector<3x32xf32> to vector<1x3x32xf32>
    tpu.vector_store %arg7[%c0_30, %c5, %c0_31], %58 {strides = array<i32>} : memref<1x8x32xf32, #tpu.memory_space<vmem>>, vector<1x3x32xf32>,
    return
  }
  func.func @transform_0(%arg0: i32) -> (i32, i32, i32) {
    %c0_i32 = arith.constant 0 : i32
    %c0_i32_0 = arith.constant 0 : i32
    %c0_i32_1 = arith.constant 0 : i32
    return %arg0, %c0_i32, %c0_i32_0 : i32, i32, i32
  }
  func.func @transform_1(%arg0: i32) -> (i32, i32) {
    %c0_i32 = arith.constant 0 : i32
    %c0_i32_0 = arith.constant 0 : i32
    %c0_i32_1 = arith.constant 0 : i32
    return %c0_i32, %c0_i32_0 : i32, i32
  }
  func.func @transform_2(%arg0: i32) -> (i32, i32) {
    %c0_i32 = arith.constant 0 : i32
    %c0_i32_0 = arith.constant 0 : i32
    %c0_i32_1 = arith.constant 0 : i32
    return %c0_i32, %c0_i32_0 : i32, i32
  }
  func.func @transform_3(%arg0: i32) -> (i32, i32) {
    %c0_i32 = arith.constant 0 : i32
    %c0_i32_0 = arith.constant 0 : i32
    %c0_i32_1 = arith.constant 0 : i32
    return %c0_i32, %c0_i32_0 : i32, i32
  }
  func.func @transform_4(%arg0: i32) -> (i32, i32) {
    %c0_i32 = arith.constant 0 : i32
    %c0_i32_0 = arith.constant 0 : i32
    %c0_i32_1 = arith.constant 0 : i32
    return %c0_i32, %c0_i32_0 : i32, i32
  }
  func.func @transform_5(%arg0: i32) -> (i32, i32) {
    %c0_i32 = arith.constant 0 : i32
    %c0_i32_0 = arith.constant 0 : i32
    %c0_i32_1 = arith.constant 0 : i32
    return %c0_i32, %c0_i32_0 : i32, i32
  }
  func.func @transform_6(%arg0: i32) -> (i32, i32, i32) {
    %c0_i32 = arith.constant 0 : i32
    %c0_i32_0 = arith.constant 0 : i32
    %c0_i32_1 = arith.constant 0 : i32
    return %arg0, %c0_i32, %c0_i32_0 : i32, i32, i32
  }
}

</mosaic_0001>

<bundles_post_ra>
// kernel: tpu_custom_call.1
= control target key start
LH: loop header
LB: loop body
LE: loop exit
PB: predicated region body
PF: predicated region fallthrough
CT: control target
= control target key end

     0   :  { %11 = vsyncpa [#allocation3], 0  ;;  %s876_s0 = inlined_call_operand.vmem [shape: bf16[2,4,192], index: 0, kind: input, shape index: {}]   ;;  %s877_s1 = inlined_call_operand.vmem [shape: bf16[192,32], index: 1, kind: input, shape index: {}]   ;;  %s878_s2 = inlined_call_operand.vmem [shape: f32[1,32], index: 2, kind: input, shape index: {}]   ;;  %s879_s3 = inlined_call_operand.vmem [shape: f32[5,32], index: 3, kind: input, shape index: {}]   ;;  %s880_s4 = inlined_call_operand.vmem [shape: f32[1,32], index: 4, kind: input, shape index: {}]   ;;  %s881_s5 = inlined_call_operand.vmem [shape: f32[1,32], index: 5, kind: input, shape index: {}]   ;;  %s882_s6 = inlined_call_operand.hbm [shape: f32[2,8,32], index: 6, kind: output, shape index: {}]  }
   0x1   :  { %13 = vsyncpa [#allocation3 + $0x1], 0  ;;  %s715_s21 = smov 0   ;;  %s717_s22 = smov 0  }
   0x2   :  { %s719_s23 = smov 0   ;;  %s721_s24 = smov 0  }
   0x3 LB: > { %s736_s25 = sadd.s32 4294967295, %s675_s24   ;;  %s530_s26 = sadd.s32 4294967294, %s675_s24   ;;  %s675_s24 = sphi %s721_s24, %s888_s24   ;;  %s671_s23 = sphi %s719_s23, %s887_s23   ;;  %s667_s22 = sphi %s717_s22, %s886_s22   ;;  %s663_s21 = sphi %s715_s21, %s885_s21  }
   0x4   : > { %s740_s27 = sadd.s32 1, %s675_s24   ;;  %s157_s28 = sadd.s32 1, %s671_s23 }
   0x5   : > { %s154_s29 = ssub.s32 %s675_s24, %s740_s27  ;;  %p167_p0 = scmp.ne.s32.totalorder %s671_s23, %s667_s22 }
   0x6   : > { %p155_p1 = scmp.eq.s32.totalorder %s154_s29, 0  ;;  %p168_p2 = scmp.eq.s32.totalorder %s736_s25, 1 }
   0x7   : > { %p173_p3 = scmp.ne.s32.totalorder %s667_s22, %s663_s21  ;;  %p174_p4 = scmp.eq.s32.totalorder %s530_s26, 1 }
   0x8   : > { %s751_s30 = scalar_select %p155_p1, %s671_s23, %s157_s28  }
   0x9   : > { %p753_p5 = por %p168_p2, %p167_p0  ;;  %p757_p6 = por %p174_p4, %p173_p3 }
   0xa   : > { %p533_p7 = scmp.ge.s32.totalorder %s675_s24, 1  ;;  %p215_p8 = scmp.lt.s32.totalorder %s675_s24, 3 }
   0xc   : > { %p216_p9 = pnand %p533_p7, %p215_p8 }
   0xd   : > { %v597_v0 = vld [vmem:[%s877_s1] sm:$0xff] (!%p216_p9)   ;;  %v677_v1 = vmov (!%p216_p9), 0   ;;  %p245_p10 = scmp.lt.s32.totalorder (!%p216_p9), %s736_s25, 1  ;;  %v598_v2 = vld [vmem:[%s877_s1 + $0x8] sm:$0xff] (!%p216_p9)   ;;  %v599_v3 = vld [vmem:[%s877_s1 + $0x10] sm:$0xff] (!%p216_p9)   ;;  %vm364_vm0 = vcmask (!%p216_p9), 523264   ;;  %v441_v48 = vlaneseq (!%p216_p9) }
   0xe   : > { %219 = sbr.rel (%p216_p9) target bundleno = 603 (0x25b), region = 44  ;;  %368 = vmatprep.subr.bf16.mxu0 (!%p216_p9), %v677_v1  ;;  %v600_v4 = vld [vmem:[%s877_s1 + $0x18] sm:$0xff] (!%p216_p9)   ;;  %v278_v6 = vld [vmem:[%s878_s2] sm:$0x1] (!%p216_p9)  ;;  %vm408_vm1 = vcmask (!%p216_p9), 253952   ;;  %v602_v12 = vld [vmem:[%s877_s1 + $0x28] sm:$0xff] (!%p216_p9)  }
   0xf   : > { %369 = vmatpush1.bf16.msra.mxu0 (!%p216_p9), %v597_v0  ;;  %v279_v8 = vld [vmem:[%s879_s3] sm:$0x1] (!%p216_p9)  ;;  %v603_v13 = vld [vmem:[%s877_s1 + $0x30] sm:$0xff] (!%p216_p9)   ;;  %v604_v14 = vld [vmem:[%s877_s1 + $0x38] sm:$0xff] (!%p216_p9)   ;;  %vm426_vm2 = vcmask (!%p216_p9), 257024   ;;  %s242_s14 = sand.u32 (!%p216_p9), 1, %s667_s22  }
  0x10   : > { %370 = vmatprep.subr.bf16.mxu0 (!%p216_p9), %v677_v1  ;;  %v601_v9 = vld [vmem:[%s877_s1 + $0x20] sm:$0xff] (!%p216_p9)   ;;  %v280_v10 = vadd.f32 (!%p216_p9), %v279_v8, %v278_v6  ;;  %v606_v16 = vld [vmem:[%s877_s1 + $0x48] sm:$0xff] (!%p216_p9)   ;;  %v607_v17 = vld [vmem:[%s877_s1 + $0x50] sm:$0xff] (!%p216_p9)   ;;  %s534_s17 = sshll.u32 (!%p216_p9), %s242_s14, 3  ;;  %vm455_vm3 = vcmask (!%p216_p9), 256000   ;;  %v678_v45 = vmov (!%p216_p9), 0.0  }
  0x11   : > { %v605_v15 = vld [vmem:[%s877_s1 + $0x40] sm:$0xff] (!%p216_p9)   ;;  %v608_v18 = vld [vmem:[%s877_s1 + $0x58] sm:$0xff] (!%p216_p9)   ;;  %s244_s20 = scalar_lea.vmem (!%p216_p9), [#allocation2], %s534_s17  ;;  %v442_v50 = vshrl.u32 (!%p216_p9), %v441_v48, 7  ;;  %s552_s26 = sshll.u32 (!%p216_p9), %s736_s25, 7 }
  0x12   : > { %v409_v11 = vsel (!%p216_p9), %vm408_vm1, %v280_v10, 0.0  ;;  %v281_v24 = vld [vmem:[%s879_s3 + $0x1] sm:$0xf] (!%p216_p9)  ;;  %v276_v35 = vld [vmem:[%s880_s4] sm:$0x1] (!%p216_p9)  ;;  %s471_s28 = sshll.u32 (!%p216_p9), %s244_s20, 4  ;;  %s831_s10 = scalar_lea.hbm (!%p216_p9), %s882_s6, %s552_s26  ;;  %s833_s28 = int_to_ptr.vmem [resolvable:$true] %s471_s28 }
  0x13   : > { %371 = vmatpush1.bf16.msra.mxu0 (!%p216_p9), %v598_v2  ;;  %410 = vadd.xlane.f32.xlu0 (!%p216_p9), %v409_v11  ;;  %v277_v37 = vld [vmem:[%s881_s5] sm:$0x1] (!%p216_p9)  ;;  %456 = vst.msk [vmem:[%s244_s20 + $0x5] sm:$0x7] (!%p216_p9), %vm455_vm3, %v678_v45  ;;  %v443_v51 = vsub.s32 (!%p216_p9), 0, %v442_v50  ;;  %s458_s11 = scalar_lea.sflag (!%p216_p9), [#allocation3], %s242_s14 }
  0x14   : > { %372 = vmatprep.subr.bf16.mxu0 (!%p216_p9), %v677_v1  ;;  %s613_s12 = scalar_lea.vmem (!%p216_p9), %s833_s28, 128 }
  0x15   : > { %s246_s13 = scalar_select %p245_p10, %s736_s25, 1  ;;  %v444_v52 = vrot.slane %v276_v35, %v443_v51  ;;  %v451_v55 = vrot.slane %v277_v37, %v443_v51 }
  0x16   : > { %p614_p11 = scmp.ne.s32.totalorder %s833_s28, %s613_s12  ;;  %s679_s25 = smov [#allocation2]  }
  0x17   : > { %s555_s16 = sshll.u32 %s246_s13, 2  ;;  %373 = vmatpush1.bf16.msra.mxu0 %v599_v3  ;;  %s617_s13 = sshll.u32 %s679_s25, 4  ;;  %s618_s13 = int_to_ptr.vmem [resolvable:$false] %s617_s13 }
  0x18   : > { %s249_s19 = scalar_lea.vmem %s876_s0, %s555_s16  ;;  %374 = vmatprep.subr.bf16.mxu0 %v677_v1  ;;  %p615_p12 = pnand %p614_p11, %p753_p5 }
  0x19   : > { %v537_v5 = vld.sshfl [vmem:[%s249_s19] sm:$0x33 pattern:$0x76325410]  ;;  %s619_s15 = scalar_lea.vmem %s618_s13, 256  ;;  %p620_p0 = scmp.lt.s32.totalorder %s833_s28, %s618_s13 }
  0x1a   : > { %v290_v7 = vcombine.high %v537_v5, %v537_v5  ;;  %p616_p13 = pneg %p615_p12  ;;  %p621_p1 = scmp.lt.s32.totalorder %s619_s15, %s613_s12 }
  0x1b   : > { %375 = vmatpush1.bf16.msra.mxu0 %v600_v4 }
  0x1c   : > { %376 = vmatprep.subr.bf16.mxu0 %v677_v1  ;;  %550 = vmatprep.mubr.msk.bf16.mxu0 %vm364_vm0, %v290_v7  ;;  %p622_p2 = por %p621_p1, %p620_p0 }
  0x1e   : > { %p623_p3 = pnand %p622_p2, %p616_p13 }
  0x1f   : > { %377 = vmatpush1.bf16.msra.mxu0 %v601_v9 }
  0x20   : > { %378 = vmatprep.subr.bf16.mxu0 %v677_v1 }
  0x23   : > { %379 = vmatpush1.bf16.msra.mxu0 %v602_v12 }
  0x24   : > { %380 = vmatprep.subr.bf16.mxu0 %v677_v1 }
  0x27   : > { %381 = vmatpush1.bf16.msra.mxu0 %v603_v13 }
  0x28   : > { %382 = vmatprep.subr.bf16.mxu0 %v677_v1 }
  0x2b   : > { %383 = vmatpush1.bf16.msra.mxu0 %v604_v14 }
  0x2c   : > { %384 = vmatprep.subr.bf16.mxu0 %v677_v1 }
  0x2f   : > { %385 = vmatpush1.bf16.msra.mxu0 %v605_v15 }
  0x30   : > { %386 = vmatprep.subr.bf16.mxu0 %v677_v1 }
  0x33   : > { %387 = vmatpush1.bf16.msra.mxu0 %v606_v16 }
  0x34   : > { %388 = vmatprep.subr.bf16.mxu0 %v677_v1 }
  0x37   : > { %389 = vmatpush1.bf16.msra.mxu0 %v607_v17 }
  0x38   : > { %390 = vmatprep.subr.bf16.mxu0 %v677_v1 }
  0x3b   : > { %391 = vmatpush1.bf16.msra.mxu0 %v608_v18 }
  0x3e   : > { %401 = vmatmul.mubr.bf16.vlgmr.msra.gmra.mrb[0].mxu0 %v537_v5 }
  0xa0   : > { %v411_v19 = vpop.xlane.xlu0 %410 }
  0xa1   : > { %v413_v20 = vmul.f32 0.03125, %v411_v19 }
  0xa3   : > { %v414_v21 = vsub.f32 %v280_v10, %v413_v20 }
  0xa5   : > { %v415_v22 = vmul.f32 %v414_v21, %v414_v21 }
  0xa7   : > { %v416_v23 = vsel %vm408_vm1, %v415_v22, 0.0 }
  0xa8   : > { %417 = vadd.xlane.f32.xlu1 %v416_v23 }
 0x111   : > { %v402_v25 = vpop.f32.mrb[0].mxu0 }
 0x112   : > { %v403_v26 = vadd.f32 %v402_v25, %v281_v24  ;;  %v404_v27 = vpop.f32.mrb[1].mxu0 }
 0x113   : > { %v405_v28 = vpop.f32.mrb[2].mxu0 }
 0x114   : > { %v406_v29 = vpop.f32.mrb[3].mxu0  ;;  %v427_v30 = vsel %vm426_vm2, %v403_v26, 0.0 }
 0x115   : > { %428 = vadd.xlane.f32.xlu0 %v427_v30 }
 0x135   : > { %v418_v31 = vpop.xlane.xlu1 %417 }
 0x136   : > { %v419_v32 = vmul.f32 0.03125, %v418_v31 }
 0x138   : > { %v420_v33 = vadd.f32 1e-05, %v419_v32 }
 0x13a   : > { %609 = vrsqrt.f32 %v420_v33 }
 0x144   : > { %v610_v34 = vpop.eup %609 }
 0x145   : > { %v422_v36 = vmul.f32 %v610_v34, %v414_v21 }
 0x147   : > { %v423_v38 = vmul.f32 %v422_v36, %v276_v35 }
 0x149   : > { %v424_v39 = vadd.f32 %v423_v38, %v277_v37 }
 0x14b   : > { %425 = vst.msk [vmem:[%s244_s20] sm:$0x1] %vm408_vm1, %v424_v39 }
 0x1a2   : > { %v429_v40 = vpop.xlane.xlu0 %428 }
 0x1a3   : > { %v430_v41 = vmul.f32 0.03125, %v429_v40 }
 0x1a5   : > { %v431_v42 = vsub.f32 %v403_v26, %v430_v41 }
 0x1a7   : > { %v432_v43 = vmul.f32 %v431_v42, %v431_v42 }
 0x1a9   : > { %v433_v44 = vsel %vm426_vm2, %v432_v43, 0.0 }
 0x1aa   : > { %434 = vadd.xlane.f32.xlu1 %v433_v44 }
 0x237   : > { %v435_v46 = vpop.xlane.xlu1 %434 }
 0x238   : > { %v436_v47 = vmul.f32 0.03125, %v435_v46 }
 0x23a   : > { %v437_v49 = vadd.f32 1e-05, %v436_v47 }
 0x23c   : > { %611 = vrsqrt.f32 %v437_v49 }
 0x246   : > { %v612_v53 = vpop.eup %611 }
 0x247   : > { %v439_v54 = vmul.f32 %v612_v53, %v431_v42 }
 0x249   : > { %v446_v56 = vmul.f32 %v444_v52, %v439_v54 }
 0x24b   : > { %v453_v57 = vadd.f32 %v451_v55, %v446_v56 }
 0x24d   : > { %454 = vst.msk [vmem:[%s244_s20 + $0x1] sm:$0xf] %vm426_vm2, %v453_v57 }
 0x24e   : > { %626 = shalt.err (!%p623_p3)
}
 0x24f   : > { %s627_s14 = scalar_lea.hbm %s831_s10, 128  ;;  %s631_s18 = scalar_lea.hbm %s882_s6, 256 }
 0x250   : > { %p628_p4 = scmp.ne.s32.totalorder %s831_s10, %s627_s14  ;;  %p632_p9 = scmp.lt.u32.totalorder %s831_s10, %s882_s6 }
 0x251   : > { %p633_p10 = scmp.lt.u32.totalorder %s631_s18, %s627_s14  ;;  %p635_p12 = scmp.lt.u32.totalorder %s627_s14, %s831_s10 }
 0x252   : > { %p629_p7 = pnand %p628_p4, %p753_p5 }
 0x253   : > { %p634_p11 = por %p633_p10, %p632_p9 }
 0x254   : > { %p630_p8 = pneg %p629_p7 }
 0x255   : > { %p636_p13 = por %p635_p12, %p634_p11 }
 0x257   : > { %p637_p0 = pnand %p636_p13, %p630_p8 }
 0x259   : > { %640 = shalt.err (!%p637_p0)
}
 0x25a   : > { %556 = dma.vmem_to_hbm [thread:$0]  (%p753_p5), %s833_s28, 128, %s831_s10, %s458_s11  }
 0x25b PF: > { %p562_p1 = scmp.ge.s32.totalorder %s675_s24, 2  ;;  %s483_s26 = sand.u32 1, %s663_s21  }
 0x25c   : > { %s484_s29 = scalar_lea.sflag [#allocation3], %s483_s26 }
 0x25d   : > { %p559_p2 = pnand %p562_p1, %p757_p6 }
 0x25f   : > { %658 = dma.done.wait (!%p559_p2), %s484_s29, 128  }
 0x260   : > { %660 = vsyncadd (!%p559_p2), %s484_s29, 4294967168  ;;  %p16_p3 = scmp.ge.s32.totalorder %s740_s27, 4   ;;  %s885_s21 = smov %s667_s22 }
 0x261   : > { %s886_s22 = smov %s671_s23  ;;  %s887_s23 = smov %s751_s30 }
 0x262   : > { %s888_s24 = smov %s740_s27  ;;  %18 = sbr.rel (!%p16_p3) target bundleno = 3 (0x3), region = 79 }
 0x269   :  { %489 = vsyncpa [#allocation3], 1 }
 0x26a   :  { %491 = vsyncpa [#allocation3 + $0x1], 1 }

</bundles_post_ra>
